<compile_context>
chip_gen: v7x
topology: tpu7x:2x2x1
jax: 0.10.0
libtpu: 0.0.40
codegen_flags: <defaults>
</compile_context>

<pallas_src>
import functools
import math

import jax
import jax.numpy as jnp
from jax.experimental import pallas as pl
from jax.experimental.pallas import tpu as pltpu

LANE = 128
SUBLANE = 8
MAX_BLOCK_ROWS = 4096  # 4096x128 f32 = 2 MiB/buffer; double-buffered total ~5 MiB


def _round_up(x: int, m: int) -> int:
    return ((x + m - 1) // m) * m


def _bce_partial_kernel(w_ref, y_ref, out_ref, *, block_rows: int, valid_rows: int,
                        needs_row_mask: bool):
    """Per-block partial sums of clamped log-likelihood (sign/1/E folded in wrapper)."""
    w = w_ref[...]                       # (block_rows, 128) f32
    y_is_one = y_ref[...] != 0           # (block_rows, 128) from int8 labels

    # Binary labels: BCE element = -log(where(y, w, 1-w)); torch clamps log at -100.
    # We accumulate +max(log(arg), -100) and apply the (-1/E) scale in the wrapper.
    arg = jnp.where(y_is_one, w, 1.0 - w)
    logv = jnp.maximum(jnp.log(arg), -100.0)

    if needs_row_mask:
        # Last grid block is ragged: rows >= valid_rows hold unspecified data.
        # Mask with a select (NOT a multiply) so NaN/Inf garbage cannot propagate.
        i = pl.program_id(0)
        row = jax.lax.broadcasted_iota(jnp.int32, (block_rows, LANE), 0) + i * block_rows
        logv = jnp.where(row < valid_rows, logv, 0.0)

    # (block_rows,128) -> (block_rows//8, 8, 128): sublane-split reshape (tile-aligned,
    # free) + axis-0 sum = pure vreg adds, no cross-lane/XLU reduce in the hot loop.
    out_ref[...] = jnp.sum(logv.reshape(block_rows // SUBLANE, SUBLANE, LANE),
                           axis=0, keepdims=True)


def falsify_low_pt_edge_weight_loss(w, y, edge_index=None, pt=None, *,
                                    pt_thld: float = 0.0):
    """JAX/Pallas equivalent of FalsifyLowPtEdgeWeightLoss(+BCE).forward."""
    E = w.shape[0]
    w = w.astype(jnp.float32)

    # --- falsify low-pt edges (XLA glue: gather + mask + int8 cast fuse into one pass) ---
    if not math.isclose(pt_thld, 0.0):
        assert edge_index is not None and pt is not None
        y_eff = y.astype(bool) & (pt[edge_index[0, :]] > pt_thld)
    else:
        # TODO(synk): torch BCE accepts soft labels on this path; we assume binary labels.
        y_eff = y.astype(bool)
    y_i8 = y_eff.astype(jnp.int8)  # 1 B/edge label stream

    # --- geometry: (rows, 128) view, rows a multiple of 8 so the reshape is tile-aligned ---
    e_pad = _round_up(E, SUBLANE * LANE)
    if e_pad != E:
        # TODO(synk): unaligned E costs one extra pass over w here; a fully copy-free
        # version would need 1-D blocks + in-kernel lane masking.
        w = jnp.pad(w, (0, e_pad - E), constant_values=1.0)      # neutral: -log(1) = 0
        y_i8 = jnp.pad(y_i8, (0, e_pad - E), constant_values=1)
    rows = e_pad // LANE
    w2 = w.reshape(rows, LANE)        # free bitcast (no copy) when E was already aligned
    y2 = y_i8.reshape(rows, LANE)

    block_rows = min(MAX_BLOCK_ROWS, rows)          # rows is a multiple of 8
    num_blocks = (rows + block_rows - 1) // block_rows
    needs_row_mask = (rows % block_rows) != 0       # ragged last block -> in-kernel mask

    kernel = functools.partial(_bce_partial_kernel, block_rows=block_rows,
                               valid_rows=rows, needs_row_mask=needs_row_mask)

    partials = pl.pallas_call(
        kernel,
        out_shape=jax.ShapeDtypeStruct((num_blocks, SUBLANE, LANE), jnp.float32),
        grid=(num_blocks,),
        in_specs=[
            pl.BlockSpec((block_rows, LANE), lambda i: (i, 0)),
            pl.BlockSpec((block_rows, LANE), lambda i: (i, 0)),
        ],
        out_specs=pl.BlockSpec((1, SUBLANE, LANE), lambda i: (i, 0, 0)),
        compiler_params=pltpu.CompilerParams(dimension_semantics=("parallel",)),
        cost_estimate=pl.CostEstimate(
            flops=6 * E, transcendentals=E,
            bytes_accessed=5 * E + num_blocks * SUBLANE * LANE * 4),
    )(w2, y2)

    # Finalize: fold the BCE negation and the 1/E mean scale into one scalar multiply.
    return jnp.sum(partials) * (-1.0 / float(E))


def _reference(w, y, edge_index, pt, pt_thld):
    """Pure-JAX reference mirroring the PyTorch code."""
    if not math.isclose(pt_thld, 0.0):
        y_eff = (y.astype(bool) & (pt[edge_index[0, :]] > pt_thld)).astype(jnp.float32)
    else:
        y_eff = y.astype(jnp.float32)
    log_w = jnp.maximum(jnp.log(w), -100.0)
    log_1mw = jnp.maximum(jnp.log(1.0 - w), -100.0)
    return jnp.mean(-(y_eff * log_w + (1.0 - y_eff) * log_1mw))


if __name__ == "__main__":
    key = jax.random.PRNGKey(0)
    k1, k2, k3, k4 = jax.random.split(key, 4)

    n_hits = 512
    n_edges = 1024
    pt_thld = 0.9

    w = jax.nn.sigmoid(jax.random.normal(k1, (n_edges,), jnp.float32))       # edge weights (0,1)
    y = (jax.random.uniform(k2, (n_edges,)) > 0.5).astype(jnp.float32)       # binary labels
    edge_index = jax.random.randint(k3, (2, n_edges), 0, n_hits, jnp.int32)  # COO edge index
    pt = jax.random.uniform(k4, (n_hits,), jnp.float32) * 2.0                # hit pt

    # pt_thld > 0 path
    loss = falsify_low_pt_edge_weight_loss(w, y, edge_index, pt, pt_thld=pt_thld)
    loss = jax.block_until_ready(loss)
    ref = _reference(w, y, edge_index, pt, pt_thld)
    assert jnp.allclose(loss, ref, rtol=1e-5, atol=1e-6), (loss, ref)

    # pt_thld == 0 path
    loss0 = falsify_low_pt_edge_weight_loss(w, y, pt_thld=0.0)
    loss0 = jax.block_until_ready(loss0)
    ref0 = _reference(w, y, edge_index, pt, 0.0)
    assert jnp.allclose(loss0, ref0, rtol=1e-5, atol=1e-6), (loss0, ref0)

    # Unaligned-E path (exercises the <=1023-element neutral pad + single-block case)
    E2 = 777
    loss2 = falsify_low_pt_edge_weight_loss(w[:E2], y[:E2], edge_index[:, :E2], pt,
                                            pt_thld=pt_thld)
    loss2 = jax.block_until_ready(loss2)
    ref2 = _reference(w[:E2], y[:E2], edge_index[:, :E2], pt, pt_thld)
    assert jnp.allclose(loss2, ref2, rtol=1e-5, atol=1e-6), (loss2, ref2)

    print("KERNEL_OK")
</pallas_src>

<mosaic_0001>
module attributes {stable_mosaic.version = 11 : i64} {
  func.func @_bce_partial_kernel(%arg0: i32, %arg1: memref<8x128xf32, #tpu.memory_space<vmem>>, %arg2: memref<8x128xi8, #tpu.memory_space<vmem>>, %arg3: memref<1x8x128xf32, #tpu.memory_space<vmem>>) attributes {dimension_semantics = [#tpu.dimension_semantics<parallel>], iteration_bounds = array<i64: 1>, scalar_prefetch = 0 : i64, scratch_operands = 0 : i64, tpu.core_type = #tpu.core_type<tc>, window_params = [{transform_indices = @transform_0, window_bounds = array<i64: 8, 128>}, {transform_indices = @transform_1, window_bounds = array<i64: 8, 128>}, {transform_indices = @transform_2, window_bounds = array<i64: 1, 8, 128>}]} {
    %c0 = arith.constant 0 : index
    %c0_0 = arith.constant 0 : index
    %0 = vector.load %arg1[%c0, %c0_0] : memref<8x128xf32, #tpu.memory_space<vmem>>, vector<8x128xf32>
    %c0_1 = arith.constant 0 : index
    %c0_2 = arith.constant 0 : index
    %1 = vector.load %arg2[%c0_1, %c0_2] : memref<8x128xi8, #tpu.memory_space<vmem>>, vector<8x128xi8>
    %c0_i8 = arith.constant 0 : i8
    %2 = vector.broadcast %c0_i8 : i8 to vector<8x128xi8>
    %3 = arith.cmpi ne, %1, %2 : vector<8x128xi8>
    %cst = arith.constant 1.000000e+00 : f32
    %4 = vector.broadcast %cst : f32 to vector<8x128xf32>
    %5 = arith.subf %4, %0 : vector<8x128xf32>
    %6 = arith.select %3, %0, %5 : vector<8x128xi1>, vector<8x128xf32>
    %7 = math.log %6 : vector<8x128xf32>
    %cst_3 = arith.constant -1.000000e+02 : f32
    %8 = vector.broadcast %cst_3 : f32 to vector<8x128xf32>
    %9 = arith.maximumf %7, %8 : vector<8x128xf32>
    %10 = vector.shape_cast %9 : vector<8x128xf32> to vector<1x8x128xf32>
    %cst_4 = arith.constant dense<0.000000e+00> : vector<8x128xf32>
    %11 = vector.multi_reduction <add>, %10, %cst_4 [0] : vector<1x8x128xf32> to vector<8x128xf32>
    %12 = vector.shape_cast %11 : vector<8x128xf32> to vector<1x8x128xf32>
    %c0_5 = arith.constant 0 : index
    %c0_6 = arith.constant 0 : index
    %c0_7 = arith.constant 0 : index
    %13 = vector.load %arg3[%c0_5, %c0_6, %c0_7] : memref<1x8x128xf32, #tpu.memory_space<vmem>>, vector<1x8x128xf32>
    tpu.vector_store %arg3[%c0_5, %c0_6, %c0_7], %12 {strides = array<i32>} : memref<1x8x128xf32, #tpu.memory_space<vmem>>, vector<1x8x128xf32>,
    return
  }
  func.func @transform_0(%arg0: i32) -> (i32, i32) {
    %c0_i32 = arith.constant 0 : i32
    %c0_i32_0 = arith.constant 0 : i32
    return %arg0, %c0_i32 : i32, i32
  }
  func.func @transform_1(%arg0: i32) -> (i32, i32) {
    %c0_i32 = arith.constant 0 : i32
    %c0_i32_0 = arith.constant 0 : i32
    return %arg0, %c0_i32 : i32, i32
  }
  func.func @transform_2(%arg0: i32) -> (i32, i32, i32) {
    %c0_i32 = arith.constant 0 : i32
    %c0_i32_0 = arith.constant 0 : i32
    %c0_i32_1 = arith.constant 0 : i32
    return %arg0, %c0_i32, %c0_i32_0 : i32, i32, i32
  }
}

</mosaic_0001>

<bundles_post_ra>
// kernel: tpu_custom_call.1
= control target key start
LH: loop header
LB: loop body
LE: loop exit
PB: predicated region body
PF: predicated region fallthrough
CT: control target
= control target key end

     0   :  { %7 = vsyncpa [#allocation3], 0  ;;  %s152_s0 = inlined_call_operand.hbm [shape: f32[8,128], index: 0, kind: input, shape index: {}]   ;;  %s153_s1 = inlined_call_operand.vmem [shape: s8[8,128], index: 1, kind: input, shape index: {}]   ;;  %s154_s2 = inlined_call_operand.hbm [shape: f32[1,8,128], index: 2, kind: output, shape index: {}]  }
   0x1   :  { %8 = vsyncpa [#allocation4], 0  ;;  %s107_s9 = smov [#allocation2]   ;;  %s59_s13 = scalar_lea.hbm %s152_s0, 128 }
   0x2   :  { %s15_s10 = sshll.u32 %s107_s9, 4  ;;  %p60_p0 = scmp.ne.s32.totalorder %s152_s0, %s59_s13  ;;  %s16_s10 = int_to_ptr.vmem [resolvable:$true] %s15_s10 }
   0x3   :  { %p63_p1 = scmp.lt.u32.totalorder %s59_s13, %s152_s0 }
   0x5   :  { %p65_p2 = pnand %p63_p1, %p60_p0 }
   0x7   :  { %68 = shalt.err (!%p65_p2)
}
   0x8   :  { %s69_s18 = scalar_lea.vmem %s16_s10, 128  ;;  %p74_p4 = scmp.lt.s32.totalorder %s16_s10, %s16_s10 }
   0x9   :  { %p70_p3 = scmp.ne.s32.totalorder %s16_s10, %s69_s18  ;;  %p75_p5 = scmp.lt.s32.totalorder %s69_s18, %s69_s18 }
   0xb   :  { %p76_p6 = por %p75_p5, %p74_p4 }
   0xd   :  { %p77_p7 = pnand %p76_p6, %p70_p3 }
   0xf   :  { %80 = shalt.err (!%p77_p7)
}
  0x10   :  { %18 = dma.hbm_to_vmem [thread:$0]  %s152_s0, 128, %s16_s10, [#allocation3]  }
  0x11   :  { %103 = dma.done.wait [#allocation3], 128  }
  0x12   :  { %104 = vsyncadd [#allocation3], 4294967168  ;;  %v26_v0 = vld [vmem:[#allocation2] sm:$0xff]  ;;  %v108_v3 = vmov 0   ;;  %s109_s23 = smov [#allocation5]  }
  0x13   :  { %v27_v1 = vld [vmem:[%s153_s1] sm:$0x3]  ;;  %v29_v2 = vsub.f32 1.0, %v26_v0  ;;  %s45_s24 = sshll.u32 %s109_s23, 4  ;;  %s46_s24 = int_to_ptr.vmem [resolvable:$true] %s45_s24 }
  0x14   :  { %vm28_vm0 = vnez %v27_v1  ;;  %s81_s0 = scalar_lea.vmem %s46_s24, 128  ;;  %p86_p9 = scmp.lt.s32.totalorder %s46_s24, %s46_s24 }
  0x15   :  { %v30_v4 = vsel %vm28_vm0, 16843009, %v108_v3  ;;  %p82_p8 = scmp.ne.s32.totalorder %s46_s24, %s81_s0  ;;  %p87_p10 = scmp.lt.s32.totalorder %s81_s0, %s81_s0 }
  0x16   :  { %v31_v5 = vunpack.c.0.s8 %v30_v4 }
  0x17   :  { %p88_p11 = por %p87_p10, %p86_p9 }
  0x18   :  { %vm32_vm1 = vcmp.ne.s32.totalorder %v31_v5, 0 }
  0x19   :  { %v33_v6 = vsel %vm32_vm1, %v26_v0, %v29_v2  ;;  %p89_p12 = pnand %p88_p11, %p82_p8 }
  0x1a   :  { %57 = vlog2.f32 %v33_v6 }
  0x24   :  { %v58_v7 = vpop.eup %57 }
  0x25   :  { %v35_v8 = vmul.f32 0.6931472, %v58_v7 }
  0x27   :  { %v36_v9 = vmax.f32 %v35_v8, -100.0 }
  0x29   :  { %38 = vst [vmem:[#allocation5] sm:$0xff] %v36_v9 }
  0x2a   :  { %92 = shalt.err (!%p89_p12)
}
  0x2b   :  { %s93_s26 = scalar_lea.hbm %s154_s2, 128 }
  0x2c   :  { %p94_p13 = scmp.ne.s32.totalorder %s154_s2, %s93_s26  ;;  %p97_p0 = scmp.lt.u32.totalorder %s93_s26, %s154_s2 }
  0x2e   :  { %p99_p1 = pnand %p97_p0, %p94_p13 }
  0x30   :  { %102 = shalt.err (!%p99_p1)
}
  0x31   :  { %48 = dma.vmem_to_hbm [thread:$0]  %s46_s24, 128, %s154_s2, [#allocation4]  }
  0x32   :  { %105 = dma.done.wait [#allocation4], 128  }
  0x33   :  { %106 = vsyncadd [#allocation4], 4294967168 }
  0x34   :  { %52 = vsyncpa [#allocation3], 1 }
  0x35   :  { %53 = vsyncpa [#allocation4], 1 }

</bundles_post_ra>
